<compile_context>
chip_gen: v6e
topology: v6e:2x2x1
jax: 0.10.0
libtpu: 0.0.40
codegen_flags: <defaults>
</compile_context>

<pallas_src>
import functools

import jax
import jax.numpy as jnp
from jax.experimental import pallas as pl
from jax.experimental.pallas import tpu as pltpu


def _layernorm_kernel(x_ref, g_ref, b_ref, o_ref, *, eps, n_elems):
    # x_ref/o_ref: (B, d0, d1)   g_ref/b_ref: per-sample-broadcastable 2D slabs
    red = (1, 2)

    # Pass 1: mean (f32 accumulation).  Stats are exact: the wrapper never pads
    # the sample, so every element of the block belongs to the sample.
    mean = jnp.sum(x_ref[...].astype(jnp.float32), axis=red, keepdims=True) * (
        1.0 / n_elems
    )

    # Pass 2: centered sum of squares -> torch-style unbiased std.  Two-pass
    # avoids catastrophic cancellation; x_ref is VMEM-resident so re-reading it
    # instead of holding one long-lived f32 copy only costs cheap vld slots.
    d = x_ref[...].astype(jnp.float32) - mean
    var = jnp.sum(d * d, axis=red, keepdims=True) * (1.0 / (n_elems - 1.0))
    inv = 1.0 / (jnp.sqrt(var) + eps)  # eps OUTSIDE the sqrt (matches module);
    #                                    exact divide: per-sample scalar, O(B) work.

    g = g_ref[...].astype(jnp.float32)  # broadcasts against (B, d0, d1)
    b = b_ref[...].astype(jnp.float32)

    out = (x_ref[...].astype(jnp.float32) - mean) * (inv * g) + b
    o_ref[...] = out.astype(o_ref.dtype)


def _ceil_to(v, m):
    return ((v + m - 1) // m) * m


@functools.lru_cache(maxsize=1)
def _physical_vmem_bytes():
    try:
        info = pltpu.get_tpu_info()
        v = getattr(info, "vmem_capacity_bytes", None)
        if v:
            return int(v)
    except Exception:
        pass
    return 64 << 20  # conservative fallback: v7x per-TensorCore VMEM


def _pick_block_batch(n, max_b):
    """Largest block batch <= max_b.  Keep >= 2 grid steps when n >= 2 (so both
    v7x TensorCores get work), prefer an even (or >=8-step) grid for balance,
    prefer exact divisors (no masked tail block), then the largest B."""
    if n <= 1 or max_b <= 1:
        return 1
    max_b = min(max_b, (n + 1) // 2)  # keep at least 2 grid steps

    def score(b):
        steps = -(-n // b)  # cdiv
        balanced = (steps % 2 == 0) or (steps >= 8)
        exact = (n % b == 0)
        return (balanced, exact, b)

    return max(range(1, max_b + 1), key=score)


def layer_norm(x, gamma, beta, eps=1e-5):
    """x: (N, C, H, W); gamma/beta: (C,).  Matches the custom torch LayerNorm module
    (per-sample mean / unbiased std over all non-batch dims, per-channel affine)."""
    N, C, H, W = x.shape
    HW = H * W
    n_elems = C * HW
    dt = x.dtype
    itemsize = dt.itemsize

    # ---- layout: never pad/slice x in HBM (that would add an un-fusable extra
    #      read+write of the whole tensor around the pallas_call).
    if n_elems % 128 == 0:
        # Lane-dense repack (free row-major reshape): each sample -> (rows, 128).
        d0, d1 = n_elems // 128, 128
        x_rep = x.reshape(N, d0, d1)
        # Per-element affine slabs (channel value repeated over its HW span),
        # stored in x.dtype; their block index never changes so they are DMA'd once.
        g_rep = jnp.broadcast_to(gamma.astype(dt).reshape(C, 1), (C, HW)).reshape(d0, d1)
        b_rep = jnp.broadcast_to(beta.astype(dt).reshape(C, 1), (C, HW)).reshape(d0, d1)
    else:
        # No-pad fallback: channel-major (C, HW).  Both trailing block dims equal
        # the full array dims (always legal); gamma/beta stay per-channel and
        # broadcast over the HW lanes inside the kernel.
        d0, d1 = C, HW
        x_rep = x.reshape(N, d0, d1)
        g_rep = gamma.astype(dt).reshape(C, 1)
        b_rep = beta.astype(dt).reshape(C, 1)

    # ---- per-generation, dtype- and buffering-aware VMEM budget
    ps_phys_elems = _ceil_to(d0, 8) * _ceil_to(d1, 128)  # physical (8,128) tiling
    ps_bytes = ps_phys_elems * itemsize                  # one sample, one buffer
    ps_f32_bytes = ps_phys_elems * 4                     # in-kernel f32 temporary
    slab_bytes = _ceil_to(g_rep.shape[0], 8) * _ceil_to(g_rep.shape[1], 128) * itemsize

    phys_vmem = _physical_vmem_bytes()
    vmem_limit = min((phys_vmem * 3) // 4, 96 << 20)  # ~96 MiB v5e/v6e, ~48 MiB v7x
    fixed = 2 * 2 * slab_bytes + (2 << 20)             # 2 slabs double-buffered + fudge
    per_sample_cost = 4 * ps_bytes + ps_f32_bytes       # 2x in + 2x out buffers + f32 temp
    max_b_budget = max(1, (vmem_limit - fixed) // per_sample_cost)
    max_b_size = max(1, (8 << 20) // ps_bytes)          # diminishing returns past ~8 MiB blocks
    # TODO(synk): if a single sample alone exceeds the VMEM budget (huge C*H*W on
    # v7x), add a second "arbitrary" grid axis over rows with scratch sum/sumsq
    # accumulators and a finalize/normalize pass; today that case needs B=1 to fit.
    B = _pick_block_batch(N, min(N, max_b_budget, max_b_size))
    grid = (pl.cdiv(N, B),)

    kernel = functools.partial(_layernorm_kernel, eps=float(eps), n_elems=float(n_elems))

    cost = pl.CostEstimate(
        flops=8 * N * n_elems,
        transcendentals=2 * N,
        bytes_accessed=2 * N * n_elems * itemsize + 2 * int(g_rep.size) * itemsize,
    )

    out_rep = pl.pallas_call(
        kernel,
        out_shape=jax.ShapeDtypeStruct((N, d0, d1), dt),
        grid_spec=pltpu.PrefetchScalarGridSpec(
            num_scalar_prefetch=0,
            grid=grid,
            in_specs=[
                pl.BlockSpec((B, d0, d1), lambda i: (i, 0, 0)),
                pl.BlockSpec(g_rep.shape, lambda i: (0, 0)),
                pl.BlockSpec(b_rep.shape, lambda i: (0, 0)),
            ],
            out_specs=pl.BlockSpec((B, d0, d1), lambda i: (i, 0, 0)),
        ),
        compiler_params=pltpu.CompilerParams(
            dimension_semantics=("parallel",),
            vmem_limit_bytes=int(vmem_limit),
        ),
        cost_estimate=cost,
    )(x_rep, g_rep, b_rep)

    return out_rep.reshape(N, C, H, W)


if __name__ == "__main__":
    def reference(x, gamma, beta, eps):
        n_, c_ = x.shape[0], x.shape[1]
        xf = x.reshape(n_, -1).astype(jnp.float32)
        n = xf.shape[1]
        mean = xf.mean(axis=1)
        std = jnp.sqrt(((xf - mean[:, None]) ** 2).sum(axis=1) / (n - 1))
        shape = (n_,) + (1,) * (x.ndim - 1)
        y = (x - mean.reshape(shape)) / (std.reshape(shape) + eps)
        pshape = (1, c_) + (1,) * (x.ndim - 2)
        return y * gamma.reshape(pshape) + beta.reshape(pshape)

    key = jax.random.PRNGKey(0)
    k1, k2, k3, k4, k5 = jax.random.split(key, 5)

    # primary case (lane-dense path): C*H*W is a multiple of 128
    N, C, H, W = 2, 4, 16, 16
    x = jax.random.normal(k1, (N, C, H, W), dtype=jnp.float32)
    gamma = jax.random.uniform(k2, (C,), dtype=jnp.float32)  # torch .uniform_()
    beta = jnp.zeros((C,), dtype=jnp.float32)                # torch.zeros(C)
    out = layer_norm(x, gamma, beta, eps=1e-5)
    jax.block_until_ready(out)
    ref = reference(x, gamma, beta, 1e-5)
    assert out.shape == x.shape
    assert jnp.allclose(out, ref, atol=1e-4, rtol=1e-4), float(jnp.max(jnp.abs(out - ref)))

    # ragged case (no-pad fallback path): C*H*W not a multiple of 128
    N2, C2, H2, W2 = 2, 3, 5, 7
    x2 = jax.random.normal(k3, (N2, C2, H2, W2), dtype=jnp.float32)
    gamma2 = jax.random.uniform(k4, (C2,), dtype=jnp.float32)
    beta2 = 0.1 * jax.random.normal(k5, (C2,), dtype=jnp.float32)
    out2 = layer_norm(x2, gamma2, beta2, eps=1e-5)
    jax.block_until_ready(out2)
    ref2 = reference(x2, gamma2, beta2, 1e-5)
    assert jnp.allclose(out2, ref2, atol=1e-4, rtol=1e-4), float(jnp.max(jnp.abs(out2 - ref2)))

    print("KERNEL_OK")
</pallas_src>

<mosaic_0001>
module attributes {stable_mosaic.version = 11 : i64} {
  func.func @_layernorm_kernel(%arg0: i32, %arg1: memref<1x8x128xf32, #tpu.memory_space<vmem>>, %arg2: memref<8x128xf32, #tpu.memory_space<vmem>>, %arg3: memref<8x128xf32, #tpu.memory_space<vmem>>, %arg4: memref<1x8x128xf32, #tpu.memory_space<vmem>>) attributes {dimension_semantics = [#tpu.dimension_semantics<parallel>], iteration_bounds = array<i64: 2>, scalar_prefetch = 0 : i64, scratch_operands = 0 : i64, tpu.core_type = #tpu.core_type<tc>, window_params = [{transform_indices = @transform_0, window_bounds = array<i64: 1, 8, 128>}, {pipeline_mode = #tpu.pipeline_mode<synchronous>, transform_indices = @transform_1, window_bounds = array<i64: 8, 128>}, {pipeline_mode = #tpu.pipeline_mode<synchronous>, transform_indices = @transform_2, window_bounds = array<i64: 8, 128>}, {transform_indices = @transform_3, window_bounds = array<i64: 1, 8, 128>}]} {
    %c0 = arith.constant 0 : index
    %c0_0 = arith.constant 0 : index
    %c0_1 = arith.constant 0 : index
    %0 = vector.load %arg1[%c0, %c0_0, %c0_1] : memref<1x8x128xf32, #tpu.memory_space<vmem>>, vector<1x8x128xf32>
    %cst = arith.constant dense<0.000000e+00> : vector<1xf32>
    %1 = vector.multi_reduction <add>, %0, %cst [1, 2] : vector<1x8x128xf32> to vector<1xf32>
    %2 = vector.shape_cast %1 : vector<1xf32> to vector<1x1x1xf32>
    %cst_2 = arith.constant 9.765625E-4 : f32
    %3 = vector.broadcast %cst_2 : f32 to vector<1x1x1xf32>
    %4 = arith.mulf %2, %3 : vector<1x1x1xf32>
    %c0_3 = arith.constant 0 : index
    %c0_4 = arith.constant 0 : index
    %c0_5 = arith.constant 0 : index
    %5 = vector.load %arg1[%c0_3, %c0_4, %c0_5] : memref<1x8x128xf32, #tpu.memory_space<vmem>>, vector<1x8x128xf32>
    %6 = vector.broadcast %4 : vector<1x1x1xf32> to vector<1x8x128xf32>
    %7 = arith.subf %5, %6 : vector<1x8x128xf32>
    %8 = arith.mulf %7, %7 : vector<1x8x128xf32>
    %cst_6 = arith.constant dense<0.000000e+00> : vector<1xf32>
    %9 = vector.multi_reduction <add>, %8, %cst_6 [1, 2] : vector<1x8x128xf32> to vector<1xf32>
    %10 = vector.shape_cast %9 : vector<1xf32> to vector<1x1x1xf32>
    %cst_7 = arith.constant 9.77517105E-4 : f32
    %11 = vector.broadcast %cst_7 : f32 to vector<1x1x1xf32>
    %12 = arith.mulf %10, %11 : vector<1x1x1xf32>
    %13 = math.sqrt %12 : vector<1x1x1xf32>
    %cst_8 = arith.constant 9.99999974E-6 : f32
    %14 = vector.broadcast %cst_8 : f32 to vector<1x1x1xf32>
    %15 = arith.addf %13, %14 : vector<1x1x1xf32>
    %cst_9 = arith.constant 1.000000e+00 : f32
    %16 = vector.broadcast %cst_9 : f32 to vector<1x1x1xf32>
    %17 = arith.divf %16, %15 : vector<1x1x1xf32>
    %c0_10 = arith.constant 0 : index
    %c0_11 = arith.constant 0 : index
    %18 = vector.load %arg2[%c0_10, %c0_11] : memref<8x128xf32, #tpu.memory_space<vmem>>, vector<8x128xf32>
    %c0_12 = arith.constant 0 : index
    %c0_13 = arith.constant 0 : index
    %19 = vector.load %arg3[%c0_12, %c0_13] : memref<8x128xf32, #tpu.memory_space<vmem>>, vector<8x128xf32>
    %c0_14 = arith.constant 0 : index
    %c0_15 = arith.constant 0 : index
    %c0_16 = arith.constant 0 : index
    %20 = vector.load %arg1[%c0_14, %c0_15, %c0_16] : memref<1x8x128xf32, #tpu.memory_space<vmem>>, vector<1x8x128xf32>
    %21 = vector.broadcast %4 : vector<1x1x1xf32> to vector<1x8x128xf32>
    %22 = arith.subf %20, %21 : vector<1x8x128xf32>
    %23 = vector.shape_cast %18 : vector<8x128xf32> to vector<1x8x128xf32>
    %24 = vector.broadcast %17 : vector<1x1x1xf32> to vector<1x8x128xf32>
    %25 = arith.mulf %24, %23 : vector<1x8x128xf32>
    %26 = arith.mulf %22, %25 : vector<1x8x128xf32>
    %27 = vector.shape_cast %19 : vector<8x128xf32> to vector<1x8x128xf32>
    %28 = arith.addf %26, %27 : vector<1x8x128xf32>
    %c0_17 = arith.constant 0 : index
    %c0_18 = arith.constant 0 : index
    %c0_19 = arith.constant 0 : index
    %29 = vector.load %arg4[%c0_17, %c0_18, %c0_19] : memref<1x8x128xf32, #tpu.memory_space<vmem>>, vector<1x8x128xf32>
    tpu.vector_store %arg4[%c0_17, %c0_18, %c0_19], %28 {strides = array<i32>} : memref<1x8x128xf32, #tpu.memory_space<vmem>>, vector<1x8x128xf32>,
    return
  }
  func.func @transform_0(%arg0: i32) -> (i32, i32, i32) {
    %c0_i32 = arith.constant 0 : i32
    %c0_i32_0 = arith.constant 0 : i32
    %c0_i32_1 = arith.constant 0 : i32
    return %arg0, %c0_i32, %c0_i32_0 : i32, i32, i32
  }
  func.func @transform_1(%arg0: i32) -> (i32, i32) {
    %c0_i32 = arith.constant 0 : i32
    %c0_i32_0 = arith.constant 0 : i32
    %c0_i32_1 = arith.constant 0 : i32
    return %c0_i32, %c0_i32_0 : i32, i32
  }
  func.func @transform_2(%arg0: i32) -> (i32, i32) {
    %c0_i32 = arith.constant 0 : i32
    %c0_i32_0 = arith.constant 0 : i32
    %c0_i32_1 = arith.constant 0 : i32
    return %c0_i32, %c0_i32_0 : i32, i32
  }
  func.func @transform_3(%arg0: i32) -> (i32, i32, i32) {
    %c0_i32 = arith.constant 0 : i32
    %c0_i32_0 = arith.constant 0 : i32
    %c0_i32_1 = arith.constant 0 : i32
    return %arg0, %c0_i32, %c0_i32_0 : i32, i32, i32
  }
}

</mosaic_0001>

<bundles_post_ra>
// kernel: tpu_custom_call.1
= control target key start
LH: loop header
LB: loop body
LE: loop exit
PB: predicated region body
PF: predicated region fallthrough
CT: control target
= control target key end

     0   :  { %8 = vsyncpa [#allocation3], 0  ;;  %s781_s0 = inlined_call_operand.hbm [shape: f32[2,8,128], index: 0, kind: input, shape index: {}]   ;;  %s782_s1 = inlined_call_operand.hbm [shape: f32[8,128], index: 1, kind: input, shape index: {}]   ;;  %s783_s2 = inlined_call_operand.hbm [shape: f32[8,128], index: 2, kind: input, shape index: {}]   ;;  %s784_s3 = inlined_call_operand.hbm [shape: f32[2,8,128], index: 3, kind: output, shape index: {}]  }
   0x1   :  { %10 = vsyncpa [#allocation3 + $0x1], 0 }
   0x2   :  { %11 = vsyncpa [#allocation6], 0 }
   0x3   :  { %12 = vsyncpa [#allocation4], 0 }
   0x4   :  { %14 = vsyncpa [#allocation4 + $0x1], 0  ;;  %s612_s12 = smov 0   ;;  %s614_s13 = smov 0  }
   0x5   :  { %s616_s14 = smov 0   ;;  %s618_s15 = smov 0  }
   0x6 LB: > { %s633_s16 = sadd.s32 4294967295, %s586_s15   ;;  %s351_s17 = sadd.s32 4294967294, %s586_s15   ;;  %s586_s15 = sphi %s618_s15, %s806_s15   ;;  %s582_s14 = sphi %s616_s14, %s805_s14   ;;  %s578_s13 = sphi %s614_s13, %s804_s13   ;;  %s574_s12 = sphi %s612_s12, %s803_s12  }
   0x7   : > { %p40_p0 = scmp.ne.s32.totalorder %s578_s13, %s574_s12  ;;  %p785_p1 = scmp.eq.s32.totalorder %s633_s16, 0 }
   0x8   : > { %p112_p3 = scmp.eq.s32.totalorder %s351_s17, 1  ;;  %p352_p5 = scmp.ge.s32.totalorder %s586_s15, 1 }
   0x9   : > { %p642_p4 = por %p785_p1, %p40_p0  ;;  %p119_p7 = scmp.lt.s32.totalorder %s586_s15, 3 }
   0xa   : > { %p647_p6 = por %p112_p3, %p40_p0  ;;  %s588_s21 = smov [#allocation5]  }
   0xb   : > { %s789_s18 = scalar_select %p642_p4, 1, 0 }
   0xc   : > { %s790_s19 = scalar_select %p647_p6, 1, 0 }
   0xd   : > { %p652_p8 = pnand %p352_p5, %p119_p7  ;;  %s132_s22 = sshll.u32 %s588_s21, 4  ;;  %s133_s22 = int_to_ptr.vmem [resolvable:$true] %s132_s22 }
   0xe   : > { %s589_s23 = smov [#allocation7]   ;;  %s666_s26 = sadd.s32 1, %s586_s15  }
   0xf   : > { %s791_s20 = scalar_select %p652_p8, 1, 0 }
  0x10   : > { %p379_p10 = pneg %p652_p8  ;;  %s143_s24 = sshll.u32 %s589_s23, 4  ;;  %s144_s24 = int_to_ptr.vmem [resolvable:$true] %s143_s24 }
  0x11   : > { %s24_s27 = ssub.s32 %s586_s15, %s666_s26  ;;  %s449_s28 = scalar_lea.vmem %s133_s22, 128 }
  0x12   : > { %p661_p11 = pnand %p379_p10, %p785_p1  ;;  %p450_p13 = scmp.ne.s32.totalorder %s133_s22, %s449_s28 }
  0x13   : > { %p457_p5 = scmp.lt.s32.totalorder %s133_s22, %s133_s22  ;;  %p458_p7 = scmp.lt.s32.totalorder %s449_s28, %s449_s28 }
  0x14   : > { %p440_p12 = pneg %p661_p11 }
  0x15   : > { %p459_p10 = por %p458_p7, %p457_p5 }
  0x16   : > { %p452_p0 = pnand %p450_p13, %p440_p12 }
  0x18   : > { %p453_p3 = pneg %p452_p0 }
  0x1a   : > { %p460_p9 = pnand %p459_p10, %p453_p3 }
  0x1c   : > { %463 = shalt.err (!%p460_p9)
}
  0x1d   : > { %382 = dma.hbm_to_vmem [thread:$0]  (!%p661_p11), %s782_s1, 128, %s133_s22, [#allocation6]  }
  0x1e   : > { %s475_s4 = scalar_lea.vmem %s144_s24, 128  ;;  %p483_p13 = scmp.lt.s32.totalorder %s144_s24, %s144_s24 }
  0x1f   : > { %p476_p1 = scmp.ne.s32.totalorder %s144_s24, %s475_s4  ;;  %p484_p0 = scmp.lt.s32.totalorder %s475_s4, %s475_s4 }
  0x21   : > { %p478_p2 = pnand %p476_p1, %p440_p12  ;;  %p485_p4 = por %p484_p0, %p483_p13 }
  0x23   : > { %p479_p6 = pneg %p478_p2 }
  0x25   : > { %p486_p8 = pnand %p485_p4, %p479_p6 }
  0x27   : > { %489 = shalt.err (!%p486_p8)
}
  0x28   : > { %385 = dma.hbm_to_vmem [thread:$0]  (!%p661_p11), %s783_s2, 128, %s144_s24, [#allocation6]  }
  0x29   : > { %p25_p1 = scmp.eq.s32.totalorder %s24_s27, 0  ;;  %s27_s7 = sadd.s32 1, %s582_s14 }
  0x2a   : > { %p34_p2 = scmp.ne.s32.totalorder %s582_s14, %s578_s13  ;;  %p35_p4 = scmp.eq.s32.totalorder %s586_s15, 0 }
  0x2b   : > { %s693_s8 = scalar_select %p25_p1, %s582_s14, %s27_s7  }
  0x2c   : > { %p36_p6 = por %p35_p4, %p34_p2  ;;  %p793_p8 = scmp.eq.s32.totalorder %s633_s16, 1 }
  0x2d   : > { %p396_p12 = scmp.lt.s32.totalorder %s586_s15, 2  ;;  %s154_s10 = sand.u32 1, %s582_s14  }
  0x2e   : > { %p697_p9 = por %p793_p8, %p34_p2  ;;  %s356_s11 = sshll.u32 %s154_s10, 3 }
  0x2f   : > { %s357_s17 = sshll.u32 %s586_s15, 7  ;;  %s158_s24 = scalar_lea.vmem [#allocation2], %s356_s11 }
  0x30   : > { %s794_s9 = scalar_select %p697_p9, 1, 0 }
  0x31   : > { %s707_s23 = scalar_lea.hbm %s781_s0, %s357_s17  ;;  %s165_s25 = sshll.u32 %s158_s24, 4  ;;  %s166_s25 = int_to_ptr.vmem [resolvable:$true] %s165_s25 }
  0x32   : > { %p709_p11 = pnand %p396_p12, %p36_p6  ;;  %s155_s28 = scalar_lea.sflag [#allocation3], %s154_s10 }
  0x33   : > { %s490_s29 = scalar_lea.hbm %s707_s23, 128  ;;  %s495_s5 = scalar_lea.hbm %s781_s0, 256 }
  0x34   : > { %p491_p3 = scmp.ne.s32.totalorder %s707_s23, %s490_s29  ;;  %p492_p5 = pneg %p709_p11 }
  0x35   : > { %p496_p13 = scmp.lt.s32.totalorder %s707_s23, %s781_s0  ;;  %p497_p0 = scmp.lt.s32.totalorder %s495_s5, %s490_s29 }
  0x36   : > { %p493_p7 = pnand %p492_p5, %p491_p3 }
  0x37   : > { %p498_p1 = por %p497_p0, %p496_p13 }
  0x38   : > { %p494_p10 = pneg %p493_p7 }
  0x3a   : > { %p499_p2 = pnand %p498_p1, %p494_p10 }
  0x3c   : > { %502 = shalt.err (!%p499_p2)
}
  0x3d   : > { %s503_s11 = scalar_lea.vmem %s166_s25, 128  ;;  %s590_s10 = smov [#allocation2]  }
  0x3e   : > { %p504_p4 = scmp.ne.s32.totalorder %s166_s25, %s503_s11  ;;  %s508_s17 = sshll.u32 %s590_s10, 4  ;;  %s509_s17 = int_to_ptr.vmem [resolvable:$false] %s508_s17 }
  0x3f   : > { %s510_s21 = scalar_lea.vmem %s509_s17, 256  ;;  %p511_p12 = scmp.lt.s32.totalorder %s166_s25, %s509_s17 }
  0x40   : > { %p506_p6 = pnand %p504_p4, %p492_p5  ;;  %p512_p3 = scmp.lt.s32.totalorder %s510_s21, %s503_s11 }
  0x42   : > { %p507_p8 = pneg %p506_p6  ;;  %p513_p7 = por %p512_p3, %p511_p12 }
  0x44   : > { %p514_p9 = pnand %p513_p7, %p507_p8 }
  0x46   : > { %517 = shalt.err (!%p514_p9)
}
  0x47   : > { %389 = dma.hbm_to_vmem [thread:$0]  (!%p709_p11), %s707_s23, 128, %s166_s25, %s155_s28  }
  0x48   : > { %p796_p10 = scmp.ne.s32.totalorder %s791_s20, 0 }
  0x49   : > { %s730_s22 = sand.u32 (!%p796_p10), 1, %s578_s13   ;;  %p797_p5 = scmp.ne.s32.totalorder (!%p796_p10), %s789_s18, 0 }
  0x4a   : > { %174 = sbr.rel (%p796_p10) target bundleno = 445 (0x1bd), region = 32  ;;  %s359_s24 = sshll.u32 (!%p796_p10), %s730_s22, 3 }
  0x4b   : > { %s177_s29 = scalar_lea.sflag (!%p796_p10), [#allocation3], %s730_s22  ;;  %s180_s30 = scalar_lea.vmem (!%p796_p10), [#allocation2], %s359_s24 }
  0x4f   : > { %561 = dma.done.wait (%p797_p5), %s177_s29, 128  }
  0x50   : > { %563 = vsyncadd (%p797_p5), %s177_s29, 4294967168  ;;  %p798_p9 = scmp.eq.s32.totalorder %s633_s16, 0 }
  0x52   : > { %565 = dma.done.wait (%p798_p9), [#allocation6], 256   ;;  %p799_p11 = pmov %p798_p9 }
  0x53   : > { %v211_v0 = vld [vmem:[%s180_s30] sm:$0xff]  ;;  %v242_v25 = vld [vmem:[#allocation5] sm:$0xff]  ;;  %v243_v28 = vld [vmem:[#allocation7] sm:$0xff]  ;;  %s364_s18 = sshll.u32 %s633_s16, 7  ;;  %s210_s20 = scalar_lea.vmem [#allocation8], %s359_s24 }
  0x54   : > { %567 = vsyncadd (%p799_p11), [#allocation6], 4294967040  ;;  %212 = vadd.xlane.f32.xlu0 %v211_v0  ;;  %s262_s23 = sshll.u32 %s210_s20, 4  ;;  %s260_s28 = scalar_lea.hbm %s784_s3, %s364_s18  ;;  %s263_s23 = int_to_ptr.vmem [resolvable:$true] %s262_s23 }
  0x55   : > { %s249_s4 = scalar_lea.sflag [#allocation4], %s730_s22  ;;  %s518_s5 = scalar_lea.vmem %s263_s23, 128 }
  0x56   : > { %p519_p13 = scmp.ne.s32.totalorder %s263_s23, %s518_s5  ;;  %p800_p0 = scmp.ne.s32.totalorder %s794_s9, 0 }
  0x57   : > { %s591_s6 = smov [#allocation8]  }
  0x58   : > { %p520_p1 = pnand %p519_p13, %p800_p0  ;;  %s522_s7 = sshll.u32 %s591_s6, 4  ;;  %s523_s7 = int_to_ptr.vmem [resolvable:$false] %s522_s7 }
  0x59   : > { %s524_s16 = scalar_lea.vmem %s523_s7, 256  ;;  %p525_p4 = scmp.lt.s32.totalorder %s263_s23, %s523_s7 }
  0x5a   : > { %p521_p2 = pneg %p520_p1  ;;  %p526_p6 = scmp.lt.s32.totalorder %s524_s16, %s518_s5 }
  0x5c   : > { %p527_p8 = por %p526_p6, %p525_p4 }
  0x5e   : > { %p528_p12 = pnand %p527_p8, %p521_p2 }
  0xdd   : > { %v213_v1 = vpop.xlane.xlu0 %212 }
  0xde   : > { %v214_v2 = vrot.slane %v213_v1, 4 }
  0xe0   : > { %v215_v3 = vadd.f32 %v214_v2, %v213_v1 }
  0xe2   : > { %v216_v4 = vrot.slane %v215_v3, 2 }
  0xe4   : > { %v217_v5 = vadd.f32 %v216_v4, %v215_v3 }
  0xe6   : > { %v218_v6 = vrot.slane %v217_v5, 1 }
  0xe8   : > { %v219_v7 = vadd.f32 %v218_v6, %v217_v5 }
  0xea   : > { %v220_v8 = vmul.f32 0.0009765625, %v219_v7 }
  0xec   : > { %v221_v9 = vsub.f32 %v211_v0, %v220_v8 }
  0xee   : > { %v222_v10 = vmul.f32 %v221_v9, %v221_v9 }
  0xf0   : > { %223 = vadd.xlane.f32.xlu0 %v222_v10 }
 0x179   : > { %v224_v11 = vpop.xlane.xlu0 %223 }
 0x17a   : > { %v225_v12 = vrot.slane %v224_v11, 4 }
 0x17c   : > { %v226_v13 = vadd.f32 %v225_v12, %v224_v11 }
 0x17e   : > { %v227_v14 = vrot.slane %v226_v13, 2 }
 0x180   : > { %v228_v15 = vadd.f32 %v227_v14, %v226_v13 }
 0x182   : > { %v229_v16 = vrot.slane %v228_v15, 1 }
 0x184   : > { %v230_v17 = vadd.f32 %v229_v16, %v228_v15 }
 0x186   : > { %v231_v18 = vmul.f32 0.0009775171, %v230_v17 }
 0x188   : > { %434 = vrsqrt.f32 %v231_v18  ;;  %vm234_vm0 = vcmp.eq.f32.partialorder %v231_v18, inf  ;;  %v237_v21 = vand.u32 2147483648, %v231_v18  ;;  %vm236_vm1 = vcmp.eq.f32.partialorder %v231_v18, 0.0 }
 0x195   : > { %v435_v19 = vpop.eup %434 }
 0x196   : > { %v233_v20 = vmul.f32 %v435_v19, %v231_v18 }
 0x198   : > { %v235_v22 = vsel %vm234_vm0, %v231_v18, %v233_v20 }
 0x199   : > { %v238_v23 = vsel %vm236_vm1, %v237_v21, %v235_v22 }
 0x19a   : > { %v239_v24 = vadd.f32 1e-05, %v238_v23 }
 0x19c   : > { %436 = vrcp.f32 %v239_v24 }
 0x1a9   : > { %v437_v26 = vpop.eup %436 }
 0x1aa   : > { %v244_v27 = vmul.f32 %v437_v26, %v242_v25 }
 0x1ac   : > { %v245_v29 = vmul.f32 %v244_v27, %v221_v9 }
 0x1ae   : > { %v246_v30 = vadd.f32 %v245_v29, %v243_v28 }
 0x1b0   : > { %247 = vst [vmem:[%s210_s20] sm:$0xff] %v246_v30 }
 0x1b1   : > { %531 = shalt.err (!%p528_p12)
}
 0x1b2   : > { %s532_s11 = scalar_lea.hbm %s260_s28, 128  ;;  %s536_s21 = scalar_lea.hbm %s784_s3, 256 }
 0x1b3   : > { %p533_p3 = scmp.ne.s32.totalorder %s260_s28, %s532_s11  ;;  %p537_p5 = scmp.lt.s32.totalorder %s260_s28, %s784_s3 }
 0x1b4   : > { %p538_p9 = scmp.lt.s32.totalorder %s536_s21, %s532_s11 }
 0x1b5   : > { %p534_p7 = pnand %p533_p3, %p800_p0 }
 0x1b6   : > { %p539_p11 = por %p538_p9, %p537_p5 }
 0x1b7   : > { %p535_p10 = pneg %p534_p7 }
 0x1b9   : > { %p540_p13 = pnand %p539_p11, %p535_p10 }
 0x1bb   : > { %543 = shalt.err (!%p540_p13)
}
 0x1bc   : > { %377 = dma.vmem_to_hbm [thread:$0]  (%p800_p0), %s263_s23, 128, %s260_s28, %s249_s4  }
 0x1bd PF: > { %s274_s29 = sand.u32 1, %s574_s12   ;;  %p801_p1 = scmp.ne.s32.totalorder %s790_s19, 0 }
 0x1be   : > { %p802_p2 = scmp.ge.s32.totalorder %s586_s15, 2  ;;  %s275_s30 = scalar_lea.sflag [#allocation4], %s274_s29 }
 0x1c0   : > { %p391_p4 = pnand %p802_p2, %p801_p1 }
 0x1c2   : > { %p392_p6 = pneg %p391_p4 }
 0x1c4   : > { %569 = dma.done.wait (%p392_p6), %s275_s30, 128  }
 0x1c5   : > { %571 = vsyncadd (%p392_p6), %s275_s30, 4294967168  ;;  %p17_p8 = scmp.ge.s32.totalorder %s666_s26, 4   ;;  %s803_s12 = smov %s578_s13 }
 0x1c6   : > { %s804_s13 = smov %s582_s14  ;;  %s805_s14 = smov %s693_s8 }
 0x1c7   : > { %s806_s15 = smov %s666_s26  ;;  %19 = sbr.rel (!%p17_p8) target bundleno = 6 (0x6), region = 85 }
 0x1cc   :  { %280 = vsyncpa [#allocation3], 1 }
 0x1cd   :  { %282 = vsyncpa [#allocation3 + $0x1], 1 }
 0x1ce   :  { %283 = vsyncpa [#allocation6], 1 }
 0x1cf   :  { %284 = vsyncpa [#allocation4], 1 }
 0x1d0   :  { %286 = vsyncpa [#allocation4 + $0x1], 1 }

</bundles_post_ra>
